<compile_context>
chip_gen: v5e
topology: v5e:2x2
jax: 0.10.0
libtpu: 0.0.40
codegen_flags: <defaults>
</compile_context>

<pallas_src>
import math
from functools import partial

import jax
import jax.numpy as jnp
from jax import lax
from jax.experimental import pallas as pl
from jax.experimental.pallas import tpu as pltpu  # noqa: F401  (TPU backend)

BN_EPS = 1e-5
LANE = 128


def _ceil8(n):
    return -(-n // 8) * 8


def _gelu(x):
    # exact GELU: 0.5 * x * (1 + erf(x / sqrt(2)))  (PyTorch nn.GELU default)
    return 0.5 * x * (1.0 + lax.erf(x * (1.0 / math.sqrt(2.0))))


def _bn_train(h, gamma, beta, inv_b):
    # Training-mode BatchNorm1d, two-pass (centered) form: numerically matches the reference.
    mean = jnp.sum(h, axis=0, keepdims=True) * inv_b
    c = h - mean
    var = jnp.sum(c * c, axis=0, keepdims=True) * inv_b          # biased variance (PyTorch)
    scale = gamma * lax.rsqrt(var + BN_EPS)                       # rsqrt -> EUP slot
    return c * scale + beta


def binary_mlp_kernel(x_ref, wa_ref, wb_ref, o_ref):
    # Static layout (mirrors pack_params):
    #   wa (lane width 512):  rows [0:d_in]        = w1
    #                         rows [r_w3:r_w3+h]   = w3 padded into lanes [0:LANE]
    #                         row  r_g1            = gamma1
    #                         row  r_g1+1          = beta1
    #                         row  r_g1+2          = b3 padded into lanes [0:LANE]
    #   wb (lane width h):    rows [0:d1]          = w2
    #                         row  d1              = gamma2
    #                         row  d1+1            = beta2
    d_in = x_ref.shape[1]
    d1 = wa_ref.shape[1]                 # 512
    hidden = wb_ref.shape[1]
    out_pad = o_ref.shape[1]             # 128 (lane-dense output slab)
    r_w3 = _ceil8(d_in)
    r_g1 = wa_ref.shape[0] - 3

    x = x_ref[...]
    inv_b = jnp.float32(1.0 / x.shape[0])        # static batch size

    # Linear(d_in, 512) [bias folded away by training-mode BN] -> BN -> GELU
    h1 = jnp.dot(x, wa_ref[0:d_in, :], preferred_element_type=jnp.float32)
    h1 = _gelu(_bn_train(h1, wa_ref[r_g1:r_g1 + 1, :], wa_ref[r_g1 + 1:r_g1 + 2, :], inv_b))

    # Linear(512, hidden) [bias folded away by BN] -> BN -> GELU, at natural hidden lane width
    h2 = jnp.dot(h1, wb_ref[0:d1, :], preferred_element_type=jnp.float32)
    h2 = _gelu(_bn_train(h2, wb_ref[d1:d1 + 1, :], wb_ref[d1 + 1:d1 + 2, :], inv_b))

    # Linear(hidden, 2) + b3, padded to 128 lanes -> unmasked lane-dense store
    out = jnp.dot(h2, wa_ref[r_w3:r_w3 + hidden, 0:out_pad],
                  preferred_element_type=jnp.float32)
    out = out + wa_ref[r_g1 + 2:r_g1 + 3, 0:out_pad]
    o_ref[...] = out.astype(o_ref.dtype)


def pack_params(raw_params):
    """Pack the 11 PyTorch-style params into 2 arrays (3 input DMAs total incl. x)."""
    (w1, b1, g1, be1, w2, b2, g2, be2, w3, b3) = raw_params
    del b1, b2  # exactly cancelled by the batch-mean subtraction of training-mode BN

    d_in, d1 = w1.shape                  # (input_dim, 512)
    h = w2.shape[1]                      # hidden_dim
    o = w3.shape[1]                      # 2

    r_w3 = _ceil8(d_in)                  # 8-aligned row offset of the w3 block
    r_g1 = r_w3 + _ceil8(h)              # 8-aligned row offset of gamma1/beta1/b3 rows
    rows_a = r_g1 + 3

    wa = jnp.zeros((rows_a, d1), jnp.float32)
    wa = wa.at[:d_in, :].set(w1)
    wa = wa.at[r_w3:r_w3 + h, :o].set(w3)      # padded lanes stay exactly zero
    wa = wa.at[r_g1, :].set(g1[0])
    wa = wa.at[r_g1 + 1, :].set(be1[0])
    wa = wa.at[r_g1 + 2, :o].set(b3[0])

    wb = jnp.zeros((d1 + 2, h), jnp.float32)   # natural hidden lane width (no 128-lane padding)
    wb = wb.at[:d1, :].set(w2)
    wb = wb.at[d1, :].set(g2[0])
    wb = wb.at[d1 + 1, :].set(be2[0])

    return (wa, wb), o


@partial(jax.jit, static_argnames=("out_dim",))
def binary_mlp_pallas(x, wa, wb, *, out_dim=2):
    B = x.shape[0]
    # No grid / no BlockSpecs: every operand is a single whole-array VMEM-resident block
    # (3 input DMAs, 1 lane-dense output DMA).  See TODO(synk) above for the large-B plan.
    out_padded = pl.pallas_call(
        binary_mlp_kernel,
        out_shape=jax.ShapeDtypeStruct((B, LANE), jnp.float32),
    )(x, wa, wb)
    return out_padded[:, :out_dim]


def binary_mlp_ref(x, raw_params):
    # Pure-JAX reference with full PyTorch semantics (biases included, two-pass BN, exact GELU).
    (w1, b1, g1, be1, w2, b2, g2, be2, w3, b3) = raw_params

    def bn(hh, g, b):
        mean = jnp.mean(hh, axis=0, keepdims=True)
        var = jnp.mean((hh - mean) ** 2, axis=0, keepdims=True)
        return g * (hh - mean) / jnp.sqrt(var + BN_EPS) + b

    h1 = jax.nn.gelu(bn(x @ w1 + b1, g1, be1), approximate=False)
    h2 = jax.nn.gelu(bn(h1 @ w2 + b2, g2, be2), approximate=False)
    return h2 @ w3 + b3


def init_params(key, input_dim, hidden_dim):
    ks = jax.random.split(key, 10)

    def lin(kw, kb, fan_in, fan_out):
        bound = 1.0 / math.sqrt(fan_in)
        w = jax.random.uniform(kw, (fan_in, fan_out), jnp.float32, -bound, bound)
        b = jax.random.uniform(kb, (1, fan_out), jnp.float32, -bound, bound)
        return w, b

    w1, b1 = lin(ks[0], ks[1], input_dim, 512)
    w2, b2 = lin(ks[2], ks[3], 512, hidden_dim)
    w3, b3 = lin(ks[4], ks[5], hidden_dim, 2)

    g1 = 1.0 + 0.1 * jax.random.normal(ks[6], (1, 512), jnp.float32)
    be1 = 0.1 * jax.random.normal(ks[7], (1, 512), jnp.float32)
    g2 = 1.0 + 0.1 * jax.random.normal(ks[8], (1, hidden_dim), jnp.float32)
    be2 = 0.1 * jax.random.normal(ks[9], (1, hidden_dim), jnp.float32)
    return (w1, b1, g1, be1, w2, b2, g2, be2, w3, b3)


if __name__ == "__main__":
    B = 8              # batch (>1 so batch-stats BatchNorm is well defined)
    input_dim = 32
    hidden_dim = 32

    key = jax.random.PRNGKey(0)
    kx, kp = jax.random.split(key)
    x = jax.random.normal(kx, (B, input_dim), jnp.float32)
    raw_params = init_params(kp, input_dim, hidden_dim)

    (wa, wb), out_dim = pack_params(raw_params)
    out = jax.block_until_ready(binary_mlp_pallas(x, wa, wb, out_dim=out_dim))
    ref = jax.block_until_ready(binary_mlp_ref(x, raw_params))

    assert out.shape == (B, 2), out.shape
    max_err = float(jnp.max(jnp.abs(out - ref)))
    assert jnp.allclose(out, ref, atol=1e-4, rtol=1e-4), max_err
    print("KERNEL_OK")
</pallas_src>

<mosaic_0001>
module attributes {stable_mosaic.version = 11 : i64} {
  func.func @binary_mlp_kernel(%arg0: memref<8x32xf32, #tpu.memory_space<vmem>>, %arg1: memref<67x512xf32, #tpu.memory_space<vmem>>, %arg2: memref<514x32xf32, #tpu.memory_space<vmem>>, %arg3: memref<8x128xf32, #tpu.memory_space<vmem>>) attributes {dimension_semantics = [], scalar_prefetch = 0 : i64, scratch_operands = 0 : i64, tpu.core_type = #tpu.core_type<tc>} {
    %c0 = arith.constant 0 : index
    %c0_0 = arith.constant 0 : index
    %0 = vector.load %arg0[%c0, %c0_0] : memref<8x32xf32, #tpu.memory_space<vmem>>, vector<8x32xf32>
    %c0_1 = arith.constant 0 : index
    %c0_2 = arith.constant 0 : index
    %1 = vector.load %arg1[%c0_1, %c0_2] : memref<67x512xf32, #tpu.memory_space<vmem>>, vector<32x512xf32>
    %cst = arith.constant dense<0.000000e+00> : vector<8x512xf32>
    %2 = tpu.matmul %0, %1, %cst {dimension_numbers = #tpu.dot_dimension_numbers<[1], [0], [0], [1], [0, 0, 1, 1], [], []>} : vector<8x32xf32>, vector<32x512xf32>, vector<8x512xf32> -> vector<8x512xf32>
    %c64 = arith.constant 64 : index
    %c0_3 = arith.constant 0 : index
    %3 = vector.load %arg1[%c64, %c0_3] : memref<67x512xf32, #tpu.memory_space<vmem>>, vector<1x512xf32>
    %c65 = arith.constant 65 : index
    %c0_4 = arith.constant 0 : index
    %4 = vector.load %arg1[%c65, %c0_4] : memref<67x512xf32, #tpu.memory_space<vmem>>, vector<1x512xf32>
    %cst_5 = arith.constant dense<0.000000e+00> : vector<512xf32>
    %5 = vector.multi_reduction <add>, %2, %cst_5 [0] : vector<8x512xf32> to vector<512xf32>
    %6 = vector.shape_cast %5 : vector<512xf32> to vector<1x512xf32>
    %cst_6 = arith.constant 1.250000e-01 : f32
    %7 = vector.broadcast %cst_6 : f32 to vector<1x512xf32>
    %8 = arith.mulf %6, %7 : vector<1x512xf32>
    %9 = vector.broadcast %8 : vector<1x512xf32> to vector<8x512xf32>
    %10 = arith.subf %2, %9 : vector<8x512xf32>
    %11 = arith.mulf %10, %10 : vector<8x512xf32>
    %cst_7 = arith.constant dense<0.000000e+00> : vector<512xf32>
    %12 = vector.multi_reduction <add>, %11, %cst_7 [0] : vector<8x512xf32> to vector<512xf32>
    %13 = vector.shape_cast %12 : vector<512xf32> to vector<1x512xf32>
    %cst_8 = arith.constant 1.250000e-01 : f32
    %14 = vector.broadcast %cst_8 : f32 to vector<1x512xf32>
    %15 = arith.mulf %13, %14 : vector<1x512xf32>
    %cst_9 = arith.constant 9.99999974E-6 : f32
    %16 = vector.broadcast %cst_9 : f32 to vector<1x512xf32>
    %17 = arith.addf %15, %16 : vector<1x512xf32>
    %18 = math.rsqrt %17 : vector<1x512xf32>
    %19 = arith.mulf %3, %18 : vector<1x512xf32>
    %20 = vector.broadcast %19 : vector<1x512xf32> to vector<8x512xf32>
    %21 = arith.mulf %10, %20 : vector<8x512xf32>
    %22 = vector.broadcast %4 : vector<1x512xf32> to vector<8x512xf32>
    %23 = arith.addf %21, %22 : vector<8x512xf32>
    %cst_10 = arith.constant 5.000000e-01 : f32
    %24 = vector.broadcast %cst_10 : f32 to vector<8x512xf32>
    %25 = arith.mulf %24, %23 : vector<8x512xf32>
    %cst_11 = arith.constant 0.707106769 : f32
    %26 = vector.broadcast %cst_11 : f32 to vector<8x512xf32>
    %27 = arith.mulf %23, %26 : vector<8x512xf32>
    %28 = math.erf %27 : vector<8x512xf32>
    %cst_12 = arith.constant 1.000000e+00 : f32
    %29 = vector.broadcast %cst_12 : f32 to vector<8x512xf32>
    %30 = arith.addf %29, %28 : vector<8x512xf32>
    %31 = arith.mulf %25, %30 : vector<8x512xf32>
    %c0_13 = arith.constant 0 : index
    %c0_14 = arith.constant 0 : index
    %32 = vector.load %arg2[%c0_13, %c0_14] : memref<514x32xf32, #tpu.memory_space<vmem>>, vector<512x32xf32>
    %cst_15 = arith.constant dense<0.000000e+00> : vector<8x32xf32>
    %33 = tpu.matmul %31, %32, %cst_15 {dimension_numbers = #tpu.dot_dimension_numbers<[1], [0], [0], [1], [0, 0, 1, 1], [], []>} : vector<8x512xf32>, vector<512x32xf32>, vector<8x32xf32> -> vector<8x32xf32>
    %c512 = arith.constant 512 : index
    %c0_16 = arith.constant 0 : index
    %34 = vector.load %arg2[%c512, %c0_16] : memref<514x32xf32, #tpu.memory_space<vmem>>, vector<1x32xf32>
    %c513 = arith.constant 513 : index
    %c0_17 = arith.constant 0 : index
    %35 = vector.load %arg2[%c513, %c0_17] : memref<514x32xf32, #tpu.memory_space<vmem>>, vector<1x32xf32>
    %cst_18 = arith.constant dense<0.000000e+00> : vector<32xf32>
    %36 = vector.multi_reduction <add>, %33, %cst_18 [0] : vector<8x32xf32> to vector<32xf32>
    %37 = vector.shape_cast %36 : vector<32xf32> to vector<1x32xf32>
    %cst_19 = arith.constant 1.250000e-01 : f32
    %38 = vector.broadcast %cst_19 : f32 to vector<1x32xf32>
    %39 = arith.mulf %37, %38 : vector<1x32xf32>
    %40 = vector.broadcast %39 : vector<1x32xf32> to vector<8x32xf32>
    %41 = arith.subf %33, %40 : vector<8x32xf32>
    %42 = arith.mulf %41, %41 : vector<8x32xf32>
    %cst_20 = arith.constant dense<0.000000e+00> : vector<32xf32>
    %43 = vector.multi_reduction <add>, %42, %cst_20 [0] : vector<8x32xf32> to vector<32xf32>
    %44 = vector.shape_cast %43 : vector<32xf32> to vector<1x32xf32>
    %cst_21 = arith.constant 1.250000e-01 : f32
    %45 = vector.broadcast %cst_21 : f32 to vector<1x32xf32>
    %46 = arith.mulf %44, %45 : vector<1x32xf32>
    %cst_22 = arith.constant 9.99999974E-6 : f32
    %47 = vector.broadcast %cst_22 : f32 to vector<1x32xf32>
    %48 = arith.addf %46, %47 : vector<1x32xf32>
    %49 = math.rsqrt %48 : vector<1x32xf32>
    %50 = arith.mulf %34, %49 : vector<1x32xf32>
    %51 = vector.broadcast %50 : vector<1x32xf32> to vector<8x32xf32>
    %52 = arith.mulf %41, %51 : vector<8x32xf32>
    %53 = vector.broadcast %35 : vector<1x32xf32> to vector<8x32xf32>
    %54 = arith.addf %52, %53 : vector<8x32xf32>
    %cst_23 = arith.constant 5.000000e-01 : f32
    %55 = vector.broadcast %cst_23 : f32 to vector<8x32xf32>
    %56 = arith.mulf %55, %54 : vector<8x32xf32>
    %cst_24 = arith.constant 0.707106769 : f32
    %57 = vector.broadcast %cst_24 : f32 to vector<8x32xf32>
    %58 = arith.mulf %54, %57 : vector<8x32xf32>
    %59 = math.erf %58 : vector<8x32xf32>
    %cst_25 = arith.constant 1.000000e+00 : f32
    %60 = vector.broadcast %cst_25 : f32 to vector<8x32xf32>
    %61 = arith.addf %60, %59 : vector<8x32xf32>
    %62 = arith.mulf %56, %61 : vector<8x32xf32>
    %c32 = arith.constant 32 : index
    %c0_26 = arith.constant 0 : index
    %63 = vector.load %arg1[%c32, %c0_26] : memref<67x512xf32, #tpu.memory_space<vmem>>, vector<32x128xf32>
    %cst_27 = arith.constant dense<0.000000e+00> : vector<8x128xf32>
    %64 = tpu.matmul %62, %63, %cst_27 {dimension_numbers = #tpu.dot_dimension_numbers<[1], [0], [0], [1], [0, 0, 1, 1], [], []>} : vector<8x32xf32>, vector<32x128xf32>, vector<8x128xf32> -> vector<8x128xf32>
    %c66 = arith.constant 66 : index
    %c0_28 = arith.constant 0 : index
    %65 = vector.load %arg1[%c66, %c0_28] : memref<67x512xf32, #tpu.memory_space<vmem>>, vector<1x128xf32>
    %66 = vector.broadcast %65 : vector<1x128xf32> to vector<8x128xf32>
    %67 = arith.addf %64, %66 : vector<8x128xf32>
    %c0_29 = arith.constant 0 : index
    %c0_30 = arith.constant 0 : index
    %68 = vector.load %arg3[%c0_29, %c0_30] : memref<8x128xf32, #tpu.memory_space<vmem>>, vector<8x128xf32>
    tpu.vector_store %arg3[%c0_29, %c0_30], %67 {strides = array<i32>} : memref<8x128xf32, #tpu.memory_space<vmem>>, vector<8x128xf32>,
    return
  }
}

</mosaic_0001>

<bundles_post_ra>
// kernel: binary_mlp_pallas.1
= control target key start
LH: loop header
LB: loop body
LE: loop exit
PB: predicated region body
PF: predicated region fallthrough
CT: control target
= control target key end

     0   :  { %vm31_vm0 = vcmask 261120   ;;  %vm234_vm11 = vcmask 1040384   ;;  %vm236_vm13 = vcmask 1042434   ;;  %vm238_vm15 = vcmask 1041408   ;;  %s1225_s1 = inlined_call_operand.vmem [shape: f32[67,512], index: 1, kind: input, shape index: {}]   ;;  %s1226_s0 = inlined_call_operand.vmem [shape: f32[8,32], index: 0, kind: input, shape index: {}]   ;;  %s1227_s2 = inlined_call_operand.vmem [shape: f32[514,32], index: 2, kind: input, shape index: {}]   ;;  %s1228_s3 = inlined_call_operand.vmem [shape: f32[8,128], index: 3, kind: output, shape index: {}]  }
   0x1   :  { %v27_v0 = vld [vmem:[%s1225_s1 + $0x60] sm:$0xff]  ;;  %v28_v1 = vld [vmem:[%s1225_s1 + $0x68] sm:$0xff]  ;;  %v29_v2 = vld [vmem:[%s1225_s1 + $0x70] sm:$0xff] }
   0x2   :  { %47 = vmatpush.msra.mxu0 %v27_v0  ;;  %67 = vmatpush.msra.mxu1 %v28_v1  ;;  %v30_v3 = vld [vmem:[%s1225_s1 + $0x78] sm:$0xff]  ;;  %v23_v4 = vld [vmem:[%s1225_s1 + $0x40] sm:$0xff]  ;;  %v24_v5 = vld [vmem:[%s1225_s1 + $0x48] sm:$0xff] }
   0x3   :  { %87 = vmatpush.msra.mxu2 %v29_v2  ;;  %107 = vmatpush.msra.mxu3 %v30_v3  ;;  %v25_v6 = vld [vmem:[%s1225_s1 + $0x50] sm:$0xff]  ;;  %v26_v7 = vld [vmem:[%s1225_s1 + $0x58] sm:$0xff]  ;;  %v19_v8 = vld [vmem:[%s1225_s1 + $0x20] sm:$0xff] }
   0x4   :  { %48 = vmatpush.msra.mxu0 %v23_v4  ;;  %68 = vmatpush.msra.mxu1 %v24_v5  ;;  %v20_v9 = vld [vmem:[%s1225_s1 + $0x28] sm:$0xff]  ;;  %v21_v10 = vld [vmem:[%s1225_s1 + $0x30] sm:$0xff]  ;;  %v22_v11 = vld [vmem:[%s1225_s1 + $0x38] sm:$0xff] }
   0x5   :  { %88 = vmatpush.msra.mxu2 %v25_v6  ;;  %108 = vmatpush.msra.mxu3 %v26_v7  ;;  %v15_v12 = vld [vmem:[%s1225_s1] sm:$0xff]  ;;  %v16_v13 = vld [vmem:[%s1225_s1 + $0x8] sm:$0xff]  ;;  %v17_v14 = vld [vmem:[%s1225_s1 + $0x10] sm:$0xff] }
   0x6   :  { %49 = vmatpush.msra.mxu0 %v19_v8  ;;  %69 = vmatpush.msra.mxu1 %v20_v9  ;;  %v18_v15 = vld [vmem:[%s1225_s1 + $0x18] sm:$0xff]  ;;  %v14_v16 = vld [vmem:[%s1226_s0] sm:$0xff] }
   0x7   :  { %89 = vmatpush.msra.mxu2 %v21_v10  ;;  %109 = vmatpush.msra.mxu3 %v22_v11 }
   0x8   :  { %50 = vmatpush.msra.mxu0 %v15_v12  ;;  %70 = vmatpush.msra.mxu1 %v16_v13 }
   0x9   :  { %90 = vmatpush.msra.mxu2 %v17_v14  ;;  %110 = vmatpush.msra.mxu3 %v18_v15 }
   0xa   :  { %701 = vmatmul.msk.f32.vlgmr.msra.gmra.mxu0 %vm31_vm0, %v14_v16  ;;  %702 = vmatmul.msk.f32.vlgmr.msra.gmra.mxu1 %vm31_vm0, %v14_v16 }
   0xb   :  { %703 = vmatmul.msk.f32.vlgmr.msra.gmra.mxu2 %vm31_vm0, %v14_v16  ;;  %704 = vmatmul.msk.f32.vlgmr.msra.gmra.mxu3 %vm31_vm0, %v14_v16 }
  0x87   :  { %v52_v17 = vpop.f32.mrf.mxu0  ;;  %v72_v18 = vpop.f32.mrf.mxu1 }
  0x88   :  { %v119_v19 = vrot.slane %v52_v17, 4  ;;  %v125_v20 = vrot.slane %v72_v18, 4 }
  0x8a   :  { %v120_v21 = vadd.f32 %v119_v19, %v52_v17  ;;  %v126_v22 = vadd.f32 %v125_v20, %v72_v18 }
  0x8c   :  { %v121_v23 = vrot.slane %v120_v21, 2  ;;  %v127_v24 = vrot.slane %v126_v22, 2 }
  0x8e   :  { %v122_v25 = vadd.f32 %v121_v23, %v120_v21  ;;  %v128_v26 = vadd.f32 %v127_v24, %v126_v22  ;;  %v92_v27 = vpop.f32.mrf.mxu2  ;;  %v112_v28 = vpop.f32.mrf.mxu3 }
  0x8f   :  { %v131_v29 = vrot.slane %v92_v27, 4  ;;  %v137_v30 = vrot.slane %v112_v28, 4 }
  0x90   :  { %v123_v31 = vrot.slane %v122_v25, 1  ;;  %v129_v32 = vrot.slane %v128_v26, 1 }
  0x91   :  { %v132_v33 = vadd.f32 %v131_v29, %v92_v27  ;;  %v138_v34 = vadd.f32 %v137_v30, %v112_v28  ;;  %v459_v30 = vld [vmem:[%s1227_s2 + $0x78] sm:$0xff] }
  0x92   :  { %v124_v35 = vadd.f32 %v123_v31, %v122_v25  ;;  %v130_v36 = vadd.f32 %v129_v32, %v128_v26  ;;  %v475_v31 = vld [vmem:[%s1227_s2 + $0xf8] sm:$0xff]  ;;  %508 = vmatpush.msrb.mxu0 %v459_v30 }
  0x93   :  { %v133_v37 = vrot.slane %v132_v33, 2  ;;  %v139_v38 = vrot.slane %v138_v34, 2  ;;  %v491_v32 = vld [vmem:[%s1227_s2 + $0x178] sm:$0xff]  ;;  %528 = vmatpush.msrb.mxu1 %v475_v31 }
  0x94   :  { %v143_v39 = vmul.f32 0.125, %v124_v35  ;;  %v144_v40 = vmul.f32 0.125, %v130_v36  ;;  %v458_v35 = vld [vmem:[%s1227_s2 + $0x70] sm:$0xff]  ;;  %548 = vmatpush.msrb.mxu2 %v491_v32  ;;  %v467_v30 = vld [vmem:[%s1227_s2 + $0xb8] sm:$0xff] }
  0x95   :  { %v134_v41 = vadd.f32 %v133_v37, %v132_v33  ;;  %v140_v42 = vadd.f32 %v139_v38, %v138_v34  ;;  %v507_v34 = vld [vmem:[%s1227_s2 + $0x1f8] sm:$0xff]  ;;  %v474_v36 = vld [vmem:[%s1227_s2 + $0xf0] sm:$0xff]  ;;  %509 = vmatpush.msrb.mxu0 %v458_v35 }
  0x96   :  { %v809_v43 = vsub.f32 %v52_v17, %v143_v39  ;;  %v811_v44 = vsub.f32 %v72_v18, %v144_v40  ;;  %568 = vmatpush.msrb.mxu3 %v507_v34  ;;  %v490_v38 = vld [vmem:[%s1227_s2 + $0x170] sm:$0xff]  ;;  %v457_v40 = vld [vmem:[%s1227_s2 + $0x68] sm:$0xff]  ;;  %529 = vmatpush.msrb.mxu1 %v474_v36  ;;  %v499_v34 = vld [vmem:[%s1227_s2 + $0x1b8] sm:$0xff] }
  0x97   :  { %v135_v45 = vrot.slane %v134_v41, 1  ;;  %v141_v46 = vrot.slane %v140_v42, 1  ;;  %v506_v39 = vld [vmem:[%s1227_s2 + $0x1f0] sm:$0xff]  ;;  %549 = vmatpush.msrb.mxu2 %v490_v38  ;;  %510 = vmatpush.msrb.mxu0 %v457_v40 }
  0x98   :  { %v151_v47 = vmul.f32 %v809_v43, %v809_v43  ;;  %v152_v48 = vmul.f32 %v811_v44, %v811_v44  ;;  %569 = vmatpush.msrb.mxu3 %v506_v39  ;;  %v450_v35 = vld [vmem:[%s1227_s2 + $0x30] sm:$0xff] }
  0x99   :  { %v136_v49 = vadd.f32 %v135_v45, %v134_v41  ;;  %v142_v50 = vadd.f32 %v141_v46, %v140_v42  ;;  %v473_v42 = vld [vmem:[%s1227_s2 + $0xe8] sm:$0xff]  ;;  %v466_v36 = vld [vmem:[%s1227_s2 + $0xb0] sm:$0xff] }
  0x9a   :  { %v155_v51 = vrot.slane %v151_v47, 4  ;;  %v161_v52 = vrot.slane %v152_v48, 4  ;;  %v489_v45 = vld [vmem:[%s1227_s2 + $0x168] sm:$0xff]  ;;  %530 = vmatpush.msrb.mxu1 %v473_v42  ;;  %v482_v39 = vld [vmem:[%s1227_s2 + $0x130] sm:$0xff] }
  0x9b   :  { %v145_v53 = vmul.f32 0.125, %v136_v49  ;;  %v146_v54 = vmul.f32 0.125, %v142_v50  ;;  %v505_v46 = vld [vmem:[%s1227_s2 + $0x1e8] sm:$0xff]  ;;  %v456_v50 = vld [vmem:[%s1227_s2 + $0x60] sm:$0xff]  ;;  %550 = vmatpush.msrb.mxu2 %v489_v45  ;;  %v498_v40 = vld [vmem:[%s1227_s2 + $0x1b0] sm:$0xff] }
  0x9c   :  { %v156_v55 = vadd.f32 %v155_v51, %v151_v47  ;;  %v162_v56 = vadd.f32 %v161_v52, %v152_v48  ;;  %v472_v51 = vld [vmem:[%s1227_s2 + $0xe0] sm:$0xff]  ;;  %570 = vmatpush.msrb.mxu3 %v505_v46  ;;  %511 = vmatpush.msrb.mxu0 %v456_v50  ;;  %v449_v45 = vld [vmem:[%s1227_s2 + $0x28] sm:$0xff] }
  0x9d   :  { %v817_v57 = vsub.f32 %v92_v27, %v145_v53  ;;  %v819_v58 = vsub.f32 %v112_v28, %v146_v54  ;;  %v488_v54 = vld [vmem:[%s1227_s2 + $0x160] sm:$0xff]  ;;  %531 = vmatpush.msrb.mxu1 %v472_v51  ;;  %v465_v46 = vld [vmem:[%s1227_s2 + $0xa8] sm:$0xff] }
  0x9e   :  { %v157_v59 = vrot.slane %v156_v55, 2  ;;  %v163_v60 = vrot.slane %v162_v56, 2  ;;  %551 = vmatpush.msrb.mxu2 %v488_v54  ;;  %v705_v38 = vld [vmem:[%s1225_s1 + $0x100] ss:$8 sm:$0xf] }
  0x9f   :  { %v153_v61 = vmul.f32 %v817_v57, %v817_v57  ;;  %v154_v62 = vmul.f32 %v819_v58, %v819_v58  ;;  %v448_v51 = vld [vmem:[%s1227_s2 + $0x20] sm:$0xff] }
  0xa0   :  { %v158_v63 = vadd.f32 %v157_v59, %v156_v55  ;;  %v164_v0 = vadd.f32 %v163_v60, %v162_v56  ;;  %v504_v55 = vld [vmem:[%s1227_s2 + $0x1e0] sm:$0xff]  ;;  %v455_v59 = vld [vmem:[%s1227_s2 + $0x58] sm:$0xff] }
  0xa1   :  { %v167_v1 = vrot.slane %v153_v61, 4  ;;  %v173_v2 = vrot.slane %v154_v62, 4  ;;  %v471_v60 = vld [vmem:[%s1227_s2 + $0xd8] sm:$0xff]  ;;  %571 = vmatpush.msrb.mxu3 %v504_v55  ;;  %512 = vmatpush.msrb.mxu0 %v455_v59  ;;  %v480_v54 = vld [vmem:[%s1227_s2 + $0x120] sm:$0xff] }
  0xa2   :  { %v159_v3 = vrot.slane %v158_v63, 1  ;;  %v165_v4 = vrot.slane %v164_v0, 1  ;;  %532 = vmatpush.msrb.mxu1 %v471_v60  ;;  %v496_v55 = vld [vmem:[%s1227_s2 + $0x1a0] sm:$0xff] }
  0xa3   :  { %v168_v5 = vadd.f32 %v167_v1, %v153_v61  ;;  %v174_v6 = vadd.f32 %v173_v2, %v154_v62  ;;  %v454_v2 = vld [vmem:[%s1227_s2 + $0x50] sm:$0xff] }
  0xa4   :  { %v160_v7 = vadd.f32 %v159_v3, %v158_v63  ;;  %v166_v8 = vadd.f32 %v165_v4, %v164_v0  ;;  %v487_v63 = vld [vmem:[%s1227_s2 + $0x158] sm:$0xff]  ;;  %v470_v3 = vld [vmem:[%s1227_s2 + $0xd0] sm:$0xff]  ;;  %513 = vmatpush.msrb.mxu0 %v454_v2 }
  0xa5   :  { %v169_v9 = vrot.slane %v168_v5, 2  ;;  %v175_v10 = vrot.slane %v174_v6, 2  ;;  %v503_v0 = vld [vmem:[%s1227_s2 + $0x1d8] sm:$0xff]  ;;  %552 = vmatpush.msrb.mxu2 %v487_v63  ;;  %533 = vmatpush.msrb.mxu1 %v470_v3 }
  0xa6   :  { %v179_v11 = vmul.f32 0.125, %v160_v7  ;;  %v180_v12 = vmul.f32 0.125, %v166_v8  ;;  %v502_v7 = vld [vmem:[%s1227_s2 + $0x1d0] sm:$0xff]  ;;  %572 = vmatpush.msrb.mxu3 %v503_v0  ;;  %v479_v2 = vld [vmem:[%s1227_s2 + $0x118] sm:$0xff] }
  0xa7   :  { %v170_v13 = vadd.f32 %v169_v9, %v168_v5  ;;  %v176_v14 = vadd.f32 %v175_v10, %v174_v6  ;;  %v486_v6 = vld [vmem:[%s1227_s2 + $0x150] sm:$0xff]  ;;  %v453_v10 = vld [vmem:[%s1227_s2 + $0x48] sm:$0xff]  ;;  %v495_v3 = vld [vmem:[%s1227_s2 + $0x198] sm:$0xff] }
  0xa8   :  { %v825_v15 = vadd.f32 1e-05, %v179_v11  ;;  %v827_v16 = vadd.f32 1e-05, %v180_v12  ;;  %v469_v11 = vld [vmem:[%s1227_s2 + $0xc8] sm:$0xff]  ;;  %553 = vmatpush.msrb.mxu2 %v486_v6  ;;  %573 = vmatpush.msrb.mxu3 %v502_v7  ;;  %v446_v6 = vld [vmem:[%s1227_s2 + $0x10] sm:$0xff] }
  0xa9   :  { %v171_v17 = vrot.slane %v170_v13, 1  ;;  %v177_v18 = vrot.slane %v176_v14, 1  ;;  %514 = vmatpush.msrb.mxu0 %v453_v10  ;;  %534 = vmatpush.msrb.mxu1 %v469_v11  ;;  %v462_v7 = vld [vmem:[%s1227_s2 + $0x90] sm:$0xff] }
  0xaa   :  { %714 = vrsqrt.f32 %v825_v15  ;;  %vm203_vm2 = vweird.f32 %v827_v16  ;;  %vm193_vm12 = vweird.f32 %v825_v15  ;;  %v494_v10 = vld [vmem:[%s1227_s2 + $0x190] sm:$0xff] }
  0xab   :  { %716 = vrsqrt.f32 %v827_v16  ;;  %v172_v19 = vadd.f32 %v171_v17, %v170_v13  ;;  %v178_v20 = vadd.f32 %v177_v18, %v176_v14  ;;  %v485_v14 = vld [vmem:[%s1227_s2 + $0x148] sm:$0xff]  ;;  %v452_v18 = vld [vmem:[%s1227_s2 + $0x40] sm:$0xff] }
  0xac   :  { %554 = vmatpush.msrb.mxu2 %v485_v14  ;;  %515 = vmatpush.msrb.mxu0 %v452_v18 }
  0xad   :  { %v181_v21 = vmul.f32 0.125, %v172_v19  ;;  %v182_v22 = vmul.f32 0.125, %v178_v20  ;;  %v468_v19 = vld [vmem:[%s1227_s2 + $0xc0] sm:$0xff] }
  0xae   :  { %535 = vmatpush.msrb.mxu1 %v468_v19  ;;  %v444_v19 = vld [vmem:[%s1227_s2] sm:$0xff] }
  0xaf   :  { %v831_v23 = vadd.f32 1e-05, %v181_v21  ;;  %v833_v24 = vadd.f32 1e-05, %v182_v22 }
  0xb0   :  { %v835_v25 = vpop.eup %714  ;;  %536 = vmatpush.msrb.mxu1 %v467_v30 }
  0xb1   :  { %v837_v26 = vpop.eup %716  ;;  %v188_v27 = vmul.f32 %v835_v25, %v825_v15  ;;  %718 = vrsqrt.f32 %v831_v23  ;;  %vm213_vm6 = vweird.f32 %v831_v23  ;;  %vm194_vm7 = vweird.f32 %v835_v25 }
  0xb2   :  { %v198_v28 = vmul.f32 %v837_v26, %v827_v16  ;;  %720 = vrsqrt.f32 %v833_v24  ;;  %vm204_vm1 = vweird.f32 %v837_v26  ;;  %v501_v16 = vld [vmem:[%s1227_s2 + $0x1c8] sm:$0xff]  ;;  %vm223_vm9 = vweird.f32 %v833_v24  ;;  %vm195_vm14 = vmor %vm193_vm12, %vm194_vm7  ;;  %537 = vmatpush.msrb.mxu1 %v466_v36 }
  0xb3   :  { %v189_v33 = vmul.f32 %v835_v25, %v188_v27  ;;  %vm934_vm3 = vmor %vm203_vm2, %vm204_vm1  ;;  %574 = vmatpush.msrb.mxu3 %v501_v16  ;;  %v493_v16 = vld [vmem:[%s1227_s2 + $0x188] sm:$0xff] }
  0xb4   :  { %v199_v29 = vmul.f32 %v837_v26, %v198_v28  ;;  %538 = vmatpush.msrb.mxu1 %v465_v46 }
  0xb5   :  { %v190_v52 = vmul.f32 0.5, %v189_v33  ;;  %v483_v33 = vld [vmem:[%s1227_s2 + $0x138] sm:$0xff] }
  0xb6   :  { %v200_v37 = vmul.f32 0.5, %v199_v29 }
  0xb7   :  { %v874_v41 = vpop.eup %718  ;;  %v191_v4 = vsub.f32 1.5, %v190_v52  ;;  %v464_v52 = vld [vmem:[%s1227_s2 + $0xa0] sm:$0xff] }
  0xb8   :  { %v885_v47 = vpop.eup %720  ;;  %v201_v48 = vsub.f32 1.5, %v200_v37  ;;  %v208_v49 = vmul.f32 %v874_v41, %v831_v23  ;;  %vm214_vm4 = vweird.f32 %v874_v41  ;;  %v484_v23 = vld [vmem:[%s1227_s2 + $0x140] sm:$0xff]  ;;  %539 = vmatpush.msrb.mxu1 %v464_v52 }
  0xb9   :  { %v218_v53 = vmul.f32 %v885_v47, %v833_v24  ;;  %vm224_vm5 = vweird.f32 %v885_v47  ;;  %v192_v20 = vmul.f32 %v835_v25, %v191_v4  ;;  %vm967_vm8 = vmor %vm213_vm6, %vm214_vm4  ;;  %v451_v24 = vld [vmem:[%s1227_s2 + $0x38] sm:$0xff]  ;;  %555 = vmatpush.msrb.mxu2 %v484_v23  ;;  %v492_v23 = vld [vmem:[%s1227_s2 + $0x180] sm:$0xff] }
  0xba   :  { %v209_v56 = vmul.f32 %v874_v41, %v208_v49  ;;  %v202_v61 = vmul.f32 %v837_v26, %v201_v48  ;;  %vm984_vm10 = vmor %vm223_vm9, %vm224_vm5  ;;  %516 = vmatpush.msrb.mxu0 %v451_v24  ;;  %v481_v48 = vld [vmem:[%s1227_s2 + $0x128] sm:$0xff] }
  0xbb   :  { %v219_v62 = vmul.f32 %v885_v47, %v218_v53  ;;  %v196_v37 = vsel %vm195_vm14, %v835_v25, %v192_v20  ;;  %556 = vmatpush.msrb.mxu2 %v483_v33  ;;  %v497_v49 = vld [vmem:[%s1227_s2 + $0x1a8] sm:$0xff]  ;;  %v460_v20 = vld [vmem:[%s1227_s2 + $0x80] sm:$0xff] }
  0xbc   :  { %v210_v1 = vmul.f32 0.5, %v209_v56  ;;  %v206_v12 = vsel %vm934_vm3, %v837_v26, %v202_v61  ;;  %v500_v26 = vld [vmem:[%s1227_s2 + $0x1c0] sm:$0xff]  ;;  %517 = vmatpush.msrb.mxu0 %v450_v35  ;;  %v447_v61 = vld [vmem:[%s1227_s2 + $0x18] sm:$0xff] }
  0xbd   :  { %v220_v5 = vmul.f32 0.5, %v219_v62  ;;  %v231_v27 = vrot.slane %v206_v12, 7  ;;  %575 = vmatpush.msrb.mxu3 %v500_v26  ;;  %557 = vmatpush.msrb.mxu2 %v482_v39  ;;  %v463_v62 = vld [vmem:[%s1227_s2 + $0x98] sm:$0xff] }
  0xbe   :  { %v211_v9 = vsub.f32 1.5, %v210_v1  ;;  %518 = vmatpush.msrb.mxu0 %v449_v45  ;;  %540 = vmatpush.msrb.mxu1 %v463_v62 }
  0xbf   :  { %v221_v13 = vsub.f32 1.5, %v220_v5  ;;  %v235_v25 = vsel %vm234_vm11, %v196_v37, %v231_v27  ;;  %576 = vmatpush.msrb.mxu3 %v499_v34  ;;  %558 = vmatpush.msrb.mxu2 %v481_v48 }
  0xc0   :  { %v212_v17 = vmul.f32 %v874_v41, %v211_v9  ;;  %519 = vmatpush.msrb.mxu0 %v448_v51  ;;  %541 = vmatpush.msrb.mxu1 %v462_v7 }
  0xc1   :  { %v222_v22 = vmul.f32 %v885_v47, %v221_v13  ;;  %577 = vmatpush.msrb.mxu3 %v498_v40  ;;  %559 = vmatpush.msrb.mxu2 %v480_v54 }
  0xc2   :  { %v216_v28 = vsel %vm967_vm8, %v874_v41, %v212_v17  ;;  %v706_v41 = vld [vmem:[%s1225_s1 + $0x101] ss:$8 sm:$0xf]  ;;  %520 = vmatpush.msrb.mxu0 %v447_v61 }
  0xc3   :  { %v232_v31 = vrot.slane %v216_v28, 6  ;;  %v226_v32 = vsel %vm984_vm10, %v885_v47, %v222_v22  ;;  %v259_v53 = vperm.slane %v706_v41, 3  ;;  %v256_v56 = vperm.slane %v706_v41, 0  ;;  %578 = vmatpush.msrb.mxu3 %v497_v49  ;;  %560 = vmatpush.msrb.mxu2 %v479_v2  ;;  %v476_v22 = vld [vmem:[%s1227_s2 + $0x100] sm:$0xff] }
  0xc4   :  { %v233_v15 = vrot.slane %v226_v32, 5  ;;  %v257_v59 = vperm.slane %v706_v41, 1  ;;  %v258_v4 = vperm.slane %v706_v41, 2  ;;  %521 = vmatpush.msrb.mxu0 %v446_v6 }
  0xc5   :  { %579 = vmatpush.msrb.mxu3 %v496_v55 }
  0xc6   :  { %v237_v42 = vsel %vm236_vm13, %v232_v31, %v233_v15 }
  0xc7   :  { %v239_v47 = vsel %vm238_vm15, %v235_v25, %v237_v42  ;;  %580 = vmatpush.msrb.mxu3 %v495_v3 }
  0xc8   :  { %v241_v50 = vmul.f32 %v705_v38, %v239_v47 }
  0xc9   :  { %581 = vmatpush.msrb.mxu3 %v494_v10 }
  0xca   :  { %v246_v60 = vperm.slane %v241_v50, 3  ;;  %v243_v63 = vperm.slane %v241_v50, 0  ;;  %v244_v0 = vperm.slane %v241_v50, 1  ;;  %v245_v1 = vperm.slane %v241_v50, 2 }
  0xcb   :  { %582 = vmatpush.msrb.mxu3 %v493_v16 }
  0xcc   :  { %v254_v5 = vmul.f32 %v246_v60, %v819_v58  ;;  %v251_v8 = vmul.f32 %v243_v63, %v809_v43  ;;  %v252_v9 = vmul.f32 %v244_v0, %v811_v44  ;;  %v478_v58 = vld [vmem:[%s1227_s2 + $0x110] sm:$0xff]  ;;  %v253_v11 = vmul.f32 %v245_v1, %v817_v57  ;;  %v445_v43 = vld [vmem:[%s1227_s2 + $0x8] sm:$0xff] }
  0xcd   :  { %v461_v44 = vld [vmem:[%s1227_s2 + $0x88] sm:$0xff]  ;;  %561 = vmatpush.msrb.mxu2 %v478_v58  ;;  %522 = vmatpush.msrb.mxu0 %v445_v43 }
  0xce   :  { %v1080_v12 = vadd.f32 %v259_v53, %v254_v5  ;;  %v1088_v13 = vadd.f32 %v256_v56, %v251_v8  ;;  %v1090_v14 = vadd.f32 %v257_v59, %v252_v9  ;;  %v477_v57 = vld [vmem:[%s1227_s2 + $0x108] sm:$0xff]  ;;  %v1098_v17 = vadd.f32 %v258_v4, %v253_v11  ;;  %542 = vmatpush.msrb.mxu1 %v461_v44 }
  0xcf   :  { %562 = vmatpush.msrb.mxu2 %v477_v57  ;;  %523 = vmatpush.msrb.mxu0 %v444_v19 }
  0xd0   :  { %v1101_v18 = vmul.f32 0.70710677, %v1080_v12  ;;  %v1110_v21 = vmul.f32 0.70710677, %v1088_v13  ;;  %v1119_v26 = vmul.f32 0.70710677, %v1090_v14  ;;  %543 = vmatpush.msrb.mxu1 %v460_v20  ;;  %583 = vmatpush.msrb.mxu3 %v492_v23 }
  0xd1   :  { %v1122_v27 = vmul.f32 0.70710677, %v1098_v17  ;;  %563 = vmatpush.msrb.mxu2 %v476_v22 }
  0xd2   :  { %v396_v28 = vmul.f32 %v1101_v18, %v1101_v18  ;;  %v276_v29 = vmul.f32 %v1110_v21, %v1110_v21  ;;  %v316_v24 = vmul.f32 %v1119_v26, %v1119_v26 }
  0xd3   :  { %v356_v30 = vmul.f32 %v1122_v27, %v1122_v27 }
  0xd4   :  { %v1132_v31 = vmin.f32 %v396_v28, 16.0  ;;  %v1134_v32 = vmin.f32 %v276_v29, 16.0  ;;  %v1136_v33 = vmin.f32 %v316_v24, 16.0 }
  0xd5   :  { %v1138_v34 = vmin.f32 %v356_v30, 16.0 }
  0xd6   :  { %v278_v15 = vmul.f32 2.1237322e-06, %v1134_v32  ;;  %v289_v35 = vmul.f32 3.8918573e-05, %v1134_v32  ;;  %v398_v36 = vmul.f32 2.1237322e-06, %v1132_v31 }
  0xd7   :  { %v318_v37 = vmul.f32 2.1237322e-06, %v1136_v33  ;;  %v329_v38 = vmul.f32 3.8918573e-05, %v1136_v33  ;;  %v358_v39 = vmul.f32 2.1237322e-06, %v1138_v34 }
  0xd8   :  { %v279_v40 = vadd.f32 0.00028619796, %v278_v15  ;;  %v290_v41 = vadd.f32 0.001143296, %v289_v35  ;;  %v369_v25 = vmul.f32 3.8918573e-05, %v1138_v34 }
  0xd9   :  { %v319_v42 = vadd.f32 0.00028619796, %v318_v37  ;;  %v330_v45 = vadd.f32 0.001143296, %v329_v38  ;;  %v359_v46 = vadd.f32 0.00028619796, %v358_v39 }
  0xda   :  { %v280_v47 = vmul.f32 %v279_v40, %v1134_v32  ;;  %v291_v48 = vmul.f32 %v290_v41, %v1134_v32  ;;  %v370_v49 = vadd.f32 0.001143296, %v369_v25  ;;  %v399_v50 = vadd.f32 0.00028619796, %v398_v36 }
  0xdb   :  { %v320_v51 = vmul.f32 %v319_v42, %v1136_v33  ;;  %v331_v52 = vmul.f32 %v330_v45, %v1136_v33  ;;  %v360_v53 = vmul.f32 %v359_v46, %v1138_v34  ;;  %v409_v54 = vmul.f32 3.8918573e-05, %v1132_v31 }
  0xdc   :  { %v281_v55 = vadd.f32 0.0036580483, %v280_v47  ;;  %v292_v56 = vadd.f32 0.014752088, %v291_v48  ;;  %v371_v59 = vmul.f32 %v370_v49, %v1138_v34  ;;  %v400_v60 = vmul.f32 %v399_v50, %v1132_v31 }
  0xdd   :  { %v321_v61 = vadd.f32 0.0036580483, %v320_v51  ;;  %v332_v62 = vadd.f32 0.014752088, %v331_v52  ;;  %v361_v63 = vadd.f32 0.0036580483, %v360_v53 }
  0xde   :  { %v282_v0 = vmul.f32 %v281_v55, %v1134_v32  ;;  %v293_v1 = vmul.f32 %v292_v56, %v1134_v32  ;;  %v372_v2 = vadd.f32 0.014752088, %v371_v59  ;;  %v401_v3 = vadd.f32 0.0036580483, %v400_v60 }
  0xdf   :  { %v322_v4 = vmul.f32 %v321_v61, %v1136_v33  ;;  %v333_v5 = vmul.f32 %v332_v62, %v1136_v33  ;;  %v362_v6 = vmul.f32 %v361_v63, %v1138_v34  ;;  %v410_v7 = vadd.f32 0.001143296, %v409_v54 }
  0xe0   :  { %v294_v8 = vadd.f32 0.112945676, %v293_v1  ;;  %v373_v9 = vmul.f32 %v372_v2, %v1138_v34  ;;  %v283_v58 = vadd.f32 0.05243302, %v282_v0  ;;  %v402_v20 = vmul.f32 %v401_v3, %v1132_v31 }
  0xe1   :  { %v334_v10 = vadd.f32 0.112945676, %v333_v5  ;;  %v411_v11 = vmul.f32 %v410_v7, %v1132_v31  ;;  %v323_v44 = vadd.f32 0.05243302, %v322_v4  ;;  %v363_v19 = vadd.f32 0.05243302, %v362_v6 }
  0xe2   :  { %v295_v43 = vmul.f32 %v294_v8, %v1134_v32  ;;  %v374_v57 = vadd.f32 0.112945676, %v373_v9  ;;  %v284_v29 = vmul.f32 %v283_v58, %v1134_v32  ;;  %v403_v39 = vadd.f32 0.05243302, %v402_v20 }
  0xe3   :  { %v335_v16 = vmul.f32 %v334_v10, %v1136_v33  ;;  %v412_v22 = vadd.f32 0.014752088, %v411_v11  ;;  %v324_v35 = vmul.f32 %v323_v44, %v1136_v33  ;;  %v364_v38 = vmul.f32 %v363_v19, %v1138_v34 }
  0xe4   :  { %v296_v23 = vadd.f32 0.4994258, %v295_v43  ;;  %v375_v28 = vmul.f32 %v374_v57, %v1138_v34  ;;  %v285_v25 = vadd.f32 0.18741608, %v284_v29  ;;  %v404_v49 = vmul.f32 %v403_v39, %v1132_v31 }
  0xe5   :  { %v336_v24 = vadd.f32 0.4994258, %v335_v16  ;;  %v413_v30 = vmul.f32 %v412_v22, %v1132_v31  ;;  %v325_v47 = vadd.f32 0.18741608, %v324_v35  ;;  %v365_v48 = vadd.f32 0.18741608, %v364_v38 }
  0xe6   :  { %v297_v15 = vmul.f32 %v296_v23, %v1134_v32  ;;  %v376_v36 = vadd.f32 0.4994258, %v375_v28  ;;  %v286_v50 = vmul.f32 %v285_v25, %v1134_v32  ;;  %v405_v55 = vadd.f32 0.18741608, %v404_v49 }
  0xe7   :  { %v337_v37 = vmul.f32 %v336_v24, %v1136_v33  ;;  %v414_v40 = vadd.f32 0.112945676, %v413_v30  ;;  %v326_v53 = vmul.f32 %v325_v47, %v1136_v33  ;;  %v366_v54 = vmul.f32 %v365_v48, %v1138_v34 }
  0xe8   :  { %v298_v41 = vadd.f32 1.0, %v297_v15  ;;  %v377_v45 = vmul.f32 %v376_v36, %v1138_v34  ;;  %v287_v61 = vadd.f32 1.1283791, %v286_v50  ;;  %v1180_v63 = vmul.f32 0.5, %v1088_v13 }
  0xe9   :  { %v338_v42 = vadd.f32 1.0, %v337_v37  ;;  %v415_v46 = vmul.f32 %v414_v40, %v1132_v31  ;;  %v327_v0 = vadd.f32 1.1283791, %v326_v53  ;;  %v367_v33 = vadd.f32 1.1283791, %v366_v54 }
  0xea   :  { %722 = vrcp.f32 %v298_v41  ;;  %v378_v51 = vadd.f32 1.0, %v377_v45  ;;  %v308_v3 = vand.u32 2147483647, %v298_v41  ;;  %v406_v34 = vmul.f32 %v405_v55, %v1132_v31 }
  0xeb   :  { %724 = vrcp.f32 %v338_v42  ;;  %v416_v52 = vadd.f32 0.4994258, %v415_v46  ;;  %v310_v4 = vand.u32 2147483648, %v298_v41  ;;  %v348_v6 = vand.u32 2147483647, %v338_v42 }
  0xec   :  { %726 = vrcp.f32 %v378_v51  ;;  %v288_v8 = vmul.f32 %v287_v61, %v1110_v21  ;;  %v350_v13 = vand.u32 2147483648, %v338_v42  ;;  %vm304_vm2 = vweird.f32 %v298_v41 }
  0xed   :  { %v417_v59 = vmul.f32 %v416_v52, %v1132_v31  ;;  %vm309_vm4 = vcmp.eq.f32.partialorder %v308_v3, 8.507059e+37  ;;  %v328_v43 = vmul.f32 %v327_v0, %v1119_v26  ;;  %vm344_vm5 = vweird.f32 %v338_v42 }
  0xee   :  { %v311_v31 = vor.u32 1.1754944e-38, %v310_v4  ;;  %vm349_vm7 = vcmp.eq.f32.partialorder %v348_v6, 8.507059e+37  ;;  %v351_v21 = vor.u32 1.1754944e-38, %v350_v13  ;;  %v388_v19 = vand.u32 2147483647, %v378_v51 }
  0xef   :  { %v1182_v32 = vadd.f32 1.0, %v417_v59  ;;  %v390_v20 = vand.u32 2147483648, %v378_v51  ;;  %v368_v26 = vmul.f32 %v367_v33, %v1122_v27  ;;  %vm384_vm10 = vweird.f32 %v378_v51 }
  0xf0   :  { %v723_v56 = vpop.eup %722  ;;  %v407_v37 = vadd.f32 1.1283791, %v406_v34  ;;  %vm389_vm12 = vcmp.eq.f32.partialorder %v388_v19, 8.507059e+37  ;;  %v269_v48 = vmul.f32 0.5, %v1090_v14 }
  0xf1   :  { %v725_v60 = vpop.eup %724  ;;  %v300_v62 = vmul.f32 %v723_v56, %v298_v41  ;;  %728 = vrcp.f32 %v1182_v32  ;;  %vm305_vm1 = vweird.f32 %v723_v56  ;;  %v391_v39 = vor.u32 1.1754944e-38, %v390_v20 }
  0xf2   :  { %v340_v1 = vmul.f32 %v725_v60, %v338_v42  ;;  %v727_v7 = vpop.eup %726  ;;  %vm345_vm3 = vweird.f32 %v725_v60  ;;  %vm306_vm6 = vmor %vm304_vm2, %vm305_vm1  ;;  %v428_v42 = vand.u32 2147483647, %v1182_v32  ;;  %v430_v45 = vand.u32 2147483648, %v1182_v32 }
  0xf3   :  { %v301_v2 = vsub.f32 1.0, %v300_v62  ;;  %v380_v10 = vmul.f32 %v727_v7, %v378_v51  ;;  %vm346_vm8 = vmor %vm344_vm5, %vm345_vm3  ;;  %vm385_vm9 = vweird.f32 %v727_v7  ;;  %vm424_vm14 = vweird.f32 %v1182_v32 }
  0xf4   :  { %v341_v5 = vsub.f32 1.0, %v340_v1  ;;  %vm386_vm11 = vmor %vm384_vm10, %vm385_vm9  ;;  %v431_v55 = vor.u32 1.1754944e-38, %v430_v45  ;;  %vm429_vm1 = vcmp.eq.f32.partialorder %v428_v42, 8.507059e+37  ;;  %v271_v1 = vmul.f32 0.5, %v1080_v12 }
  0xf5   :  { %v302_v9 = vmul.f32 %v723_v56, %v301_v2  ;;  %v381_v57 = vsub.f32 1.0, %v380_v10 }
  0xf6   :  { %v342_v58 = vmul.f32 %v725_v60, %v341_v5 }
  0xf7   :  { %v303_v11 = vadd.f32 %v723_v56, %v302_v9  ;;  %v729_v22 = vpop.eup %728  ;;  %v382_v29 = vmul.f32 %v727_v7, %v381_v57 }
  0xf8   :  { %v343_v44 = vadd.f32 %v725_v60, %v342_v58  ;;  %v420_v15 = vmul.f32 %v729_v22, %v1182_v32  ;;  %vm425_vm13 = vweird.f32 %v729_v22 }
  0xf9   :  { %v307_v16 = vsel %vm306_vm6, %v723_v56, %v303_v11  ;;  %v383_v36 = vadd.f32 %v727_v7, %v382_v29  ;;  %vm426_vm15 = vmor %vm424_vm14, %vm425_vm13  ;;  %v408_v56 = vmul.f32 %v407_v37, %v1101_v18 }
  0xfa   :  { %v312_v23 = vsel %vm309_vm4, %v311_v31, %v307_v16  ;;  %v347_v28 = vsel %vm346_vm8, %v725_v60, %v343_v44  ;;  %v421_v40 = vsub.f32 1.0, %v420_v15  ;;  %v270_v60 = vmul.f32 0.5, %v1098_v17  ;;  %v588_v15 = vld [vmem:[%s1227_s2 + $0x200] sm:$0x1] }
  0xfb   :  { %v313_v24 = vmul.f32 %v312_v23, %v288_v8  ;;  %v352_v30 = vsel %vm349_vm7, %v351_v21, %v347_v28  ;;  %v387_v25 = vsel %vm386_vm11, %v727_v7, %v383_v36 }
  0xfc   :  { %v353_v35 = vmul.f32 %v352_v30, %v328_v43  ;;  %v392_v47 = vsel %vm389_vm12, %v391_v39, %v387_v25  ;;  %v422_v27 = vmul.f32 %v729_v22, %v421_v40  ;;  %v713_v39 = vld [vmem:[%s1227_s2 + $0x201] ss:$0 sm:$0xff] }
  0xfd   :  { %v707_v38 = vclamps-f32 %v313_v24, 1.0  ;;  %v393_v50 = vmul.f32 %v392_v47, %v368_v26 }
  0xfe   :  { %v708_v41 = vclamps-f32 %v353_v35, 1.0  ;;  %v423_v52 = vadd.f32 %v729_v22, %v422_v27 }
  0xff   :  { %v436_v46 = vadd.f32 1.0, %v707_v38  ;;  %v709_v54 = vclamps-f32 %v393_v50, 1.0 }
 0x100   :  { %v437_v49 = vadd.f32 1.0, %v708_v41  ;;  %v427_v59 = vsel %vm426_vm15, %v729_v22, %v423_v52 }
 0x101   :  { %v440_v51 = vmul.f32 %v436_v46, %v1180_v63  ;;  %v438_v14 = vadd.f32 1.0, %v709_v54  ;;  %v432_v61 = vsel %vm429_vm1, %v431_v55, %v427_v59  ;;  %v671_v54 = vld [vmem:[%s1225_s1 + $0xe0] sm:$0xff] }
 0x102   :  { %v441_v53 = vmul.f32 %v437_v49, %v269_v48  ;;  %v433_v62 = vmul.f32 %v432_v61, %v408_v56  ;;  %688 = vmatpush.msra.mxu0 %v671_v54  ;;  %v670_v56 = vld [vmem:[%s1225_s1 + $0xc0] sm:$0xff] }
 0x103   :  { %524 = vmatmul.f32.vlgmr.msrb.gmra.mxu0 %v440_v51  ;;  %v442_v0 = vmul.f32 %v438_v14, %v270_v60  ;;  %v669_v60 = vld [vmem:[%s1225_s1 + $0xa0] sm:$0xff] }
 0x104   :  { %544 = vmatmul.f32.vlgmr.msrb.gmra.mxu1 %v441_v53  ;;  %v710_v63 = vclamps-f32 %v433_v62, 1.0  ;;  %689 = vmatpush.msra.mxu0 %v670_v56  ;;  %v668_v61 = vld [vmem:[%s1225_s1 + $0x80] sm:$0xff] }
 0x105   :  { %564 = vmatmul.f32.vlgmr.msrb.gmra.mxu2 %v442_v0 }
 0x106   :  { %v439_v32 = vadd.f32 1.0, %v710_v63  ;;  %690 = vmatpush.msra.mxu0 %v669_v60 }
 0x108   :  { %v443_v2 = vmul.f32 %v439_v32, %v271_v1  ;;  %691 = vmatpush.msra.mxu0 %v668_v61 }
 0x10a   :  { %584 = vmatmul.f32.vlgmr.msrb.gmra.mxu3 %v443_v2 }
 0x180   :  { %v525_v3 = vpop.f32.mrf.mxu0 }
 0x181   :  { %v545_v33 = vpop.f32.mrf.mxu1 }
 0x182   :  { %v546_v34 = vadd.f32 %v545_v33, %v525_v3 }
 0x188   :  { %v565_v18 = vpop.f32.mrf.mxu2 }
 0x189   :  { %v566_v4 = vadd.f32 %v565_v18, %v546_v34 }
 0x18d   :  { %v585_v5 = vpop.f32.mrf.mxu3 }
 0x18e   :  { %v586_v6 = vadd.f32 %v585_v5, %v566_v4 }
 0x190   :  { %v590_v17 = vsel %vm31_vm0, %v586_v6, 0.0 }
 0x191   :  { %v591_v7 = vrot.slane %v590_v17, 4 }
 0x193   :  { %v592_v8 = vadd.f32 %v591_v7, %v590_v17 }
 0x195   :  { %v593_v9 = vrot.slane %v592_v8, 2 }
 0x197   :  { %v594_v13 = vadd.f32 %v593_v9, %v592_v8 }
 0x199   :  { %v595_v58 = vrot.slane %v594_v13, 1 }
 0x19b   :  { %v596_v10 = vadd.f32 %v595_v58, %v594_v13 }
 0x19d   :  { %v597_v11 = vmul.f32 0.125, %v596_v10 }
 0x19f   :  { %v598_v12 = vsub.f32 %v586_v6, %v597_v11 }
 0x1a1   :  { %v599_v43 = vmul.f32 %v598_v12, %v598_v12 }
 0x1a3   :  { %v600_v31 = vsel %vm31_vm0, %v599_v43, 0.0 }
 0x1a4   :  { %v601_v44 = vrot.slane %v600_v31, 4 }
 0x1a6   :  { %v602_v57 = vadd.f32 %v601_v44, %v600_v31  ;;  %v672_v44 = vld [vmem:[%s1225_s1 + $0x102] ss:$0 sm:$0xff] }
 0x1a8   :  { %v603_v16 = vrot.slane %v602_v57, 2 }
 0x1aa   :  { %v604_v21 = vadd.f32 %v603_v16, %v602_v57 }
 0x1ac   :  { %v605_v19 = vrot.slane %v604_v21, 1 }
 0x1ae   :  { %v606_v20 = vadd.f32 %v605_v19, %v604_v21 }
 0x1b0   :  { %v607_v22 = vmul.f32 0.125, %v606_v20 }
 0x1b2   :  { %v608_v23 = vadd.f32 1e-05, %v607_v22 }
 0x1b4   :  { %730 = vrsqrt.f32 %v608_v23  ;;  %vm615_vm3 = vweird.f32 %v608_v23 }
 0x1ba   :  { %v731_v28 = vpop.eup %730 }
 0x1bb   :  { %v610_v29 = vmul.f32 %v731_v28, %v608_v23  ;;  %vm616_vm2 = vweird.f32 %v731_v28 }
 0x1bc   :  { %vm617_vm4 = vmor %vm615_vm3, %vm616_vm2 }
 0x1bd   :  { %v611_v24 = vmul.f32 %v731_v28, %v610_v29 }
 0x1bf   :  { %v612_v30 = vmul.f32 0.5, %v611_v24 }
 0x1c1   :  { %v613_v26 = vsub.f32 1.5, %v612_v30 }
 0x1c3   :  { %v614_v35 = vmul.f32 %v731_v28, %v613_v26 }
 0x1c5   :  { %v618_v36 = vsel %vm617_vm4, %v731_v28, %v614_v35 }
 0x1c6   :  { %v619_v37 = vmul.f32 %v618_v36, %v588_v15 }
 0x1c8   :  { %v620_v38 = vperm.slane %v619_v37, 0 }
 0x1ca   :  { %v621_v40 = vmul.f32 %v620_v38, %v598_v12 }
 0x1cc   :  { %v623_v41 = vadd.f32 %v713_v39, %v621_v40 }
 0x1ce   :  { %v625_v25 = vmul.f32 0.70710677, %v623_v41  ;;  %v624_v12 = vmul.f32 0.5, %v623_v41 }
 0x1d0   :  { %v626_v42 = vmul.f32 %v625_v25, %v625_v25 }
 0x1d2   :  { %v627_v45 = vmin.f32 %v626_v42, 16.0 }
 0x1d4   :  { %v628_v46 = vmul.f32 2.1237322e-06, %v627_v45  ;;  %v639_v47 = vmul.f32 3.8918573e-05, %v627_v45 }
 0x1d6   :  { %v629_v27 = vadd.f32 0.00028619796, %v628_v46  ;;  %v640_v48 = vadd.f32 0.001143296, %v639_v47 }
 0x1d8   :  { %v630_v49 = vmul.f32 %v629_v27, %v627_v45  ;;  %v641_v50 = vmul.f32 %v640_v48, %v627_v45 }
 0x1da   :  { %v642_v51 = vadd.f32 0.014752088, %v641_v50  ;;  %v631_v52 = vadd.f32 0.0036580483, %v630_v49 }
 0x1dc   :  { %v643_v53 = vmul.f32 %v642_v51, %v627_v45  ;;  %v632_v59 = vmul.f32 %v631_v52, %v627_v45 }
 0x1de   :  { %v644_v55 = vadd.f32 0.112945676, %v643_v53  ;;  %v633_v0 = vadd.f32 0.05243302, %v632_v59 }
 0x1e0   :  { %v645_v14 = vmul.f32 %v644_v55, %v627_v45  ;;  %v634_v32 = vmul.f32 %v633_v0, %v627_v45 }
 0x1e2   :  { %v646_v62 = vadd.f32 0.4994258, %v645_v14  ;;  %v635_v2 = vadd.f32 0.18741608, %v634_v32 }
 0x1e4   :  { %v647_v63 = vmul.f32 %v646_v62, %v627_v45  ;;  %v636_v33 = vmul.f32 %v635_v2, %v627_v45 }
 0x1e6   :  { %v648_v1 = vadd.f32 1.0, %v647_v63  ;;  %v637_v5 = vadd.f32 1.1283791, %v636_v33 }
 0x1e8   :  { %732 = vrcp.f32 %v648_v1  ;;  %v660_v4 = vand.u32 2147483648, %v648_v1  ;;  %v658_v17 = vand.u32 2147483647, %v648_v1  ;;  %vm654_vm6 = vweird.f32 %v648_v1 }
 0x1e9   :  { %v638_v9 = vmul.f32 %v637_v5, %v625_v25 }
 0x1ea   :  { %v661_v8 = vor.u32 1.1754944e-38, %v660_v4  ;;  %vm659_vm8 = vcmp.eq.f32.partialorder %v658_v17, 8.507059e+37 }
 0x1ee   :  { %v733_v3 = vpop.eup %732 }
 0x1ef   :  { %v650_v34 = vmul.f32 %v733_v3, %v648_v1  ;;  %vm655_vm5 = vweird.f32 %v733_v3 }
 0x1f0   :  { %vm656_vm7 = vmor %vm654_vm6, %vm655_vm5 }
 0x1f1   :  { %v651_v18 = vsub.f32 1.0, %v650_v34 }
 0x1f3   :  { %v652_v6 = vmul.f32 %v733_v3, %v651_v18 }
 0x1f5   :  { %v653_v7 = vadd.f32 %v733_v3, %v652_v6 }
 0x1f7   :  { %v657_v13 = vsel %vm656_vm7, %v733_v3, %v653_v7 }
 0x1f8   :  { %v662_v58 = vsel %vm659_vm8, %v661_v8, %v657_v13 }
 0x1f9   :  { %v663_v10 = vmul.f32 %v662_v58, %v638_v9 }
 0x1fb   :  { %v711_v11 = vclamps-f32 %v663_v10, 1.0 }
 0x1fd   :  { %v666_v43 = vadd.f32 1.0, %v711_v11 }
 0x1ff   :  { %v667_v31 = vmul.f32 %v666_v43, %v624_v12 }
 0x201   :  { %712 = vmatmul.msk.f32.vlgmr.msra.gmra.mxu0 %vm31_vm0, %v667_v31 }
 0x27e   :  { %v693_v57 = vpop.f32.mrf.mxu0 }
 0x27f   :  { %v694_v16 = vadd.f32 %v693_v57, %v672_v44 }
 0x281   :  { %696 = vst [vmem:[%s1228_s3] sm:$0xff] %v694_v16 }

</bundles_post_ra>
